<compile_context>
chip_gen: v7x
topology: tpu7x:2x2x1
jax: 0.10.0
libtpu: 0.0.40
codegen_flags: <defaults>
</compile_context>

<pallas_src>
import jax
import jax.numpy as jnp
from jax.experimental import pallas as pl
from jax.experimental.pallas import tpu as pltpu

EPS = 1e-5            # PyTorch BatchNorm default
STREAM_BUFFERS = 2    # set to 3 on v5e (lowest HBM BW) to hide DMA jitter


def _round_up(x, m):
    return ((x + m - 1) // m) * m


def _spec(shape, index_map, *, buffers=None):
    """BlockSpec with optional explicit buffer count (skip when it's the default)."""
    if buffers is not None and buffers != 2 and hasattr(pl, "Buffered"):
        return pl.BlockSpec(shape, index_map, pipeline_mode=pl.Buffered(buffers))
    return pl.BlockSpec(shape, index_map)


def _bn_relu(h, gb):
    """BatchNorm1d (train mode, biased var) + ReLU with folded scale/shift.

    h:  (N, F) f32 pre-activation
    gb: (2, F) f32, gb[0] = gamma, gb[1] = beta
    """
    mu = jnp.mean(h, axis=0, keepdims=True)
    var = jnp.maximum(jnp.mean(h * h, axis=0, keepdims=True) - mu * mu, 0.0)
    scale = gb[0:1, :] * jax.lax.rsqrt(var + EPS)
    shift = gb[1:2, :] - mu * scale
    return jnp.maximum(h * scale + shift, 0.0)


# ---------------------------------------------------------------------------
# Kernel 1: fully resident (small F_pad) — single grid step, no scratch.
# ---------------------------------------------------------------------------
def classifier_kernel_resident(h0_ref, w1_ref, gb1_ref, w2_ref, gb2_ref,
                               wf_ref, bf_ref, o_ref):
    h = jnp.dot(h0_ref[...], w1_ref[...], preferred_element_type=jnp.float32)
    h = _bn_relu(h, gb1_ref[...]).astype(w2_ref.dtype)               # ReLU_1 -> bf16
    z = jnp.dot(h, w2_ref[...], preferred_element_type=jnp.float32)
    z = _bn_relu(z, gb2_ref[...]).astype(wf_ref.dtype)               # ReLU_2 -> bf16
    o_ref[...] = jnp.dot(z, wf_ref[...],
                         preferred_element_type=jnp.float32) + bf_ref[...]


# ---------------------------------------------------------------------------
# Kernel 2: streamed — grid over feature chunks of Linear_2 / Linear_F.
# ---------------------------------------------------------------------------
def classifier_kernel_streamed(h0_ref, w1_ref, gb1_ref, w2_ref, gb2_ref,
                               wf_ref, bf_ref, o_ref, h1_sc, acc_sc):
    j = pl.program_id(0)

    # step 0: Linear_1 (no bias) + BN_1 (batch stats) + ReLU_1, kept in VMEM
    @pl.when(j == 0)
    def _():
        h = jnp.dot(h0_ref[...], w1_ref[...],
                    preferred_element_type=jnp.float32)               # (N, F_pad)
        h1_sc[...] = _bn_relu(h, gb1_ref[...]).astype(h1_sc.dtype)    # -> bf16
        acc_sc[...] = jnp.zeros_like(acc_sc)

    # every step: one feature-chunk of Linear_2 + BN_2 + ReLU_2 and its partial
    # contribution to Linear_F.  BN1d stats are per-feature, so per-chunk stats
    # equal full-layer stats exactly.
    z = jnp.dot(h1_sc[...], w2_ref[...],
                preferred_element_type=jnp.float32)                   # (N, TILE)
    z = _bn_relu(z, gb2_ref[...]).astype(wf_ref.dtype)
    acc_sc[...] += jnp.dot(z, wf_ref[...],
                           preferred_element_type=jnp.float32)        # (N, NC_pad)

    # last step: add final bias, store lane-dense padded logits
    @pl.when(j == pl.num_programs(0) - 1)
    def _():
        o_ref[...] = acc_sc[...] + bf_ref[...]


def _vmem_limit_bytes(n, c, f_pad, nc_pad, tile, streamed):
    bf2, f4 = 2, 4
    inv = n * c * bf2 + c * f_pad * bf2 + 2 * f_pad * f4 + nc_pad * f4
    chunks = f_pad * tile * bf2 + 2 * tile * f4 + tile * nc_pad * bf2
    if streamed:
        b = inv                                   # invariants: Buffered(1)
        b += max(STREAM_BUFFERS, 2) * chunks      # streamed w2 / gb2 / wf chunks
        b += n * f_pad * bf2 + n * nc_pad * f4    # scratch (h1, acc)
    else:
        b = 2 * inv + 2 * chunks                  # default double-buffering
    b += 2 * n * nc_pad * f4                      # output block
    # 25% headroom + 2 MiB for compiler-internal scratch; cap well below v7x's
    # 64 MiB physical VMEM so Mosaic keeps headroom.
    return int(min(max(int(b * 1.25) + (2 << 20), 4 << 20), 48 << 20))


def classifier_forward(x_nchw, params, num_classes):
    """x_nchw: (N, C, H, W) float32, H == W (GlobalAvgPool assert)."""
    N, C, H, W = x_nchw.shape
    assert H == W
    w1, gb1, w2, gb2, wf, bf = params
    F_pad = w1.shape[1]
    NC_pad = wf.shape[1]

    # GlobalAvgPool hoisted out of the kernel: pure HBM-bandwidth work handled
    # optimally by XLA; keeps the feature map out of VMEM.
    pooled = jnp.mean(x_nchw, axis=(2, 3)).astype(jnp.bfloat16)        # (N, C)

    if F_pad <= 512:
        # Everything fits comfortably in VMEM: single grid step, no streaming.
        out_padded = pl.pallas_call(
            classifier_kernel_resident,
            out_shape=jax.ShapeDtypeStruct((N, NC_pad), jnp.float32),
            grid_spec=pltpu.PrefetchScalarGridSpec(
                num_scalar_prefetch=0,
                grid=(1,),
                in_specs=[
                    pl.BlockSpec((N, C),          lambda j: (0, 0)),   # pooled
                    pl.BlockSpec((C, F_pad),      lambda j: (0, 0)),   # w1
                    pl.BlockSpec((2, F_pad),      lambda j: (0, 0)),   # [gamma1; beta1]
                    pl.BlockSpec((F_pad, F_pad),  lambda j: (0, 0)),   # w2
                    pl.BlockSpec((2, F_pad),      lambda j: (0, 0)),   # [gamma2; beta2]
                    pl.BlockSpec((F_pad, NC_pad), lambda j: (0, 0)),   # wf
                    pl.BlockSpec((1, NC_pad),     lambda j: (0, 0)),   # bf
                ],
                out_specs=pl.BlockSpec((N, NC_pad), lambda j: (0, 0))),
            compiler_params=pltpu.CompilerParams(
                dimension_semantics=("arbitrary",),
                vmem_limit_bytes=_vmem_limit_bytes(N, C, F_pad, NC_pad,
                                                   F_pad, streamed=False)),
        )(pooled, w1, gb1, w2, gb2, wf, bf)
    else:
        TILE = 512 if F_pad % 512 == 0 else 256
        assert F_pad % TILE == 0
        grid = (F_pad // TILE,)
        out_padded = pl.pallas_call(
            classifier_kernel_streamed,
            out_shape=jax.ShapeDtypeStruct((N, NC_pad), jnp.float32),
            grid_spec=pltpu.PrefetchScalarGridSpec(
                num_scalar_prefetch=0,
                grid=grid,
                in_specs=[
                    _spec((N, C),          lambda j: (0, 0), buffers=1),  # pooled (invariant)
                    _spec((C, F_pad),      lambda j: (0, 0), buffers=1),  # w1     (invariant)
                    _spec((2, F_pad),      lambda j: (0, 0), buffers=1),  # gamma1/beta1
                    _spec((F_pad, TILE),   lambda j: (0, j),
                          buffers=STREAM_BUFFERS),                        # w2 col-chunk
                    _spec((2, TILE),       lambda j: (0, j),
                          buffers=STREAM_BUFFERS),                        # gamma2/beta2 chunk
                    _spec((TILE, NC_pad),  lambda j: (j, 0),
                          buffers=STREAM_BUFFERS),                        # wf row-chunk
                    _spec((1, NC_pad),     lambda j: (0, 0), buffers=1),  # bf
                ],
                out_specs=pl.BlockSpec((N, NC_pad), lambda j: (0, 0)),
                scratch_shapes=[
                    pltpu.VMEM((N, F_pad), jnp.bfloat16),   # h1 = ReLU(BN(Linear_1))
                    pltpu.VMEM((N, NC_pad), jnp.float32),   # Linear_F accumulator
                ]),
            compiler_params=pltpu.CompilerParams(
                dimension_semantics=("arbitrary",),
                vmem_limit_bytes=_vmem_limit_bytes(N, C, F_pad, NC_pad,
                                                   TILE, streamed=True)),
        )(pooled, w1, gb1, w2, gb2, wf, bf)

    return out_padded[:, :num_classes]


def init_params(key, n_channels, num_classes):
    """Deterministic init mirroring Classifier.initilize():
       Linear weights ~ N(0, sqrt(2/fout)), Linear bias = 0,
       BatchNorm1d gamma = 1, beta = 0.  Weights stored transposed
       (in_features, out_features), zero-padded to lane-friendly shapes,
       cast to bf16 (f32 accumulation in the kernel); gamma/beta packed."""
    n_feats = min(num_classes * 20, 2048)
    f_align = 256 if n_feats > 512 else 128       # 256-aligned tiles for large F
    f_pad = _round_up(n_feats, f_align)
    nc_pad = _round_up(num_classes, 128)
    k1, k2, k3 = jax.random.split(key, 3)

    w1 = (jax.random.normal(k1, (n_channels, n_feats), jnp.float32)
          * jnp.sqrt(2.0 / n_feats))
    w2 = (jax.random.normal(k2, (n_feats, n_feats), jnp.float32)
          * jnp.sqrt(2.0 / n_feats))
    wf = (jax.random.normal(k3, (n_feats, num_classes), jnp.float32)
          * jnp.sqrt(2.0 / num_classes))

    # zero-padding is mathematically inert (padded features stay exactly 0)
    w1p = jnp.zeros((n_channels, f_pad), jnp.float32).at[:, :n_feats].set(w1)
    w2p = jnp.zeros((f_pad, f_pad), jnp.float32).at[:n_feats, :n_feats].set(w2)
    wfp = jnp.zeros((f_pad, nc_pad), jnp.float32).at[:n_feats, :num_classes].set(wf)

    w1p = w1p.astype(jnp.bfloat16)
    w2p = w2p.astype(jnp.bfloat16)
    wfp = wfp.astype(jnp.bfloat16)

    gb1 = jnp.concatenate([jnp.ones((1, f_pad), jnp.float32),
                           jnp.zeros((1, f_pad), jnp.float32)], axis=0)  # [gamma; beta]
    gb2 = jnp.concatenate([jnp.ones((1, f_pad), jnp.float32),
                           jnp.zeros((1, f_pad), jnp.float32)], axis=0)
    bf = jnp.zeros((1, nc_pad), jnp.float32)

    return (w1p, gb1, w2p, gb2, wfp, bf)


def reference_forward(x_nchw, params, num_classes):
    """Pure-JAX reference with identical numerics (bf16 weights, f32 accum)."""
    w1, gb1, w2, gb2, wf, bf = params
    pooled = jnp.mean(x_nchw, axis=(2, 3)).astype(jnp.bfloat16)

    def bn_relu(h, gb):
        mu = jnp.mean(h, axis=0, keepdims=True)
        var = jnp.mean((h - mu) ** 2, axis=0, keepdims=True)   # biased variance
        return jnp.maximum((h - mu) * jax.lax.rsqrt(var + EPS) * gb[0:1] + gb[1:2], 0.0)

    h = bn_relu(jnp.dot(pooled, w1, preferred_element_type=jnp.float32), gb1)
    h = h.astype(jnp.bfloat16)
    z = bn_relu(jnp.dot(h, w2, preferred_element_type=jnp.float32), gb2)
    z = z.astype(jnp.bfloat16)
    out = jnp.dot(z, wf, preferred_element_type=jnp.float32) + bf
    return out[:, :num_classes]


if __name__ == "__main__":
    key = jax.random.PRNGKey(0)
    kx1, kp1, kx2, kp2 = jax.random.split(key, 4)

    # --- Test 1: small shapes (resident single-step path) ---------------------
    # batch=2, nChannels=4, spatial=16x16, 10 classes -> nFeats = 200 (F_pad=256)
    N, C, H, W, NUM_CLASSES = 2, 4, 16, 16, 10
    x = jax.random.normal(kx1, (N, C, H, W), jnp.float32)
    params = init_params(kp1, C, NUM_CLASSES)

    out = jax.block_until_ready(classifier_forward(x, params, NUM_CLASSES))
    ref = jax.block_until_ready(reference_forward(x, params, NUM_CLASSES))
    assert out.shape == (N, NUM_CLASSES)
    assert jnp.all(jnp.isfinite(out))
    assert jnp.allclose(out, ref, rtol=2e-2, atol=2e-2)

    # --- Test 2: wide features (streamed / double-buffered path) --------------
    # 110 classes -> nFeats = 2048 (F_pad=2048, TILE=512, grid of 4)
    N2, C2, H2, W2, NUM_CLASSES2 = 2, 8, 8, 8, 110
    x2 = jax.random.normal(kx2, (N2, C2, H2, W2), jnp.float32)
    params2 = init_params(kp2, C2, NUM_CLASSES2)

    out2 = jax.block_until_ready(classifier_forward(x2, params2, NUM_CLASSES2))
    ref2 = jax.block_until_ready(reference_forward(x2, params2, NUM_CLASSES2))
    assert out2.shape == (N2, NUM_CLASSES2)
    assert jnp.all(jnp.isfinite(out2))
    assert jnp.allclose(out2, ref2, rtol=2e-2, atol=2e-2)

    print("KERNEL_OK")
</pallas_src>

<mosaic_0001>
module attributes {stable_mosaic.version = 11 : i64} {
  func.func @classifier_kernel_resident(%arg0: i32, %arg1: memref<2x4xbf16, #tpu.memory_space<vmem>>, %arg2: memref<4x256xbf16, #tpu.memory_space<vmem>>, %arg3: memref<2x256xf32, #tpu.memory_space<vmem>>, %arg4: memref<256x256xbf16, #tpu.memory_space<vmem>>, %arg5: memref<2x256xf32, #tpu.memory_space<vmem>>, %arg6: memref<256x128xbf16, #tpu.memory_space<vmem>>, %arg7: memref<1x128xf32, #tpu.memory_space<vmem>>, %arg8: memref<2x128xf32, #tpu.memory_space<vmem>>) attributes {dimension_semantics = [#tpu.dimension_semantics<arbitrary>], iteration_bounds = array<i64: 1>, scalar_prefetch = 0 : i64, scratch_operands = 0 : i64, tpu.core_type = #tpu.core_type<tc>, window_params = [{pipeline_mode = #tpu.pipeline_mode<synchronous>, transform_indices = @transform_0, window_bounds = array<i64: 2, 4>}, {pipeline_mode = #tpu.pipeline_mode<synchronous>, transform_indices = @transform_1, window_bounds = array<i64: 4, 256>}, {pipeline_mode = #tpu.pipeline_mode<synchronous>, transform_indices = @transform_2, window_bounds = array<i64: 2, 256>}, {pipeline_mode = #tpu.pipeline_mode<synchronous>, transform_indices = @transform_3, window_bounds = array<i64: 256, 256>}, {pipeline_mode = #tpu.pipeline_mode<synchronous>, transform_indices = @transform_4, window_bounds = array<i64: 2, 256>}, {pipeline_mode = #tpu.pipeline_mode<synchronous>, transform_indices = @transform_5, window_bounds = array<i64: 256, 128>}, {pipeline_mode = #tpu.pipeline_mode<synchronous>, transform_indices = @transform_6, window_bounds = array<i64: 1, 128>}, {pipeline_mode = #tpu.pipeline_mode<synchronous>, transform_indices = @transform_7, window_bounds = array<i64: 2, 128>}]} {
    %c0 = arith.constant 0 : index
    %c0_0 = arith.constant 0 : index
    %0 = vector.load %arg1[%c0, %c0_0] : memref<2x4xbf16, #tpu.memory_space<vmem>>, vector<2x4xbf16>
    %c0_1 = arith.constant 0 : index
    %c0_2 = arith.constant 0 : index
    %1 = vector.load %arg2[%c0_1, %c0_2] : memref<4x256xbf16, #tpu.memory_space<vmem>>, vector<4x256xbf16>
    %cst = arith.constant dense<0.000000e+00> : vector<2x256xf32>
    %2 = tpu.matmul %0, %1, %cst {dimension_numbers = #tpu.dot_dimension_numbers<[1], [0], [0], [1], [0, 0, 1, 1], [], []>} : vector<2x4xbf16>, vector<4x256xbf16>, vector<2x256xf32> -> vector<2x256xf32>
    %c0_3 = arith.constant 0 : index
    %c0_4 = arith.constant 0 : index
    %3 = vector.load %arg3[%c0_3, %c0_4] : memref<2x256xf32, #tpu.memory_space<vmem>>, vector<2x256xf32>
    %cst_5 = arith.constant dense<0.000000e+00> : vector<256xf32>
    %4 = vector.multi_reduction <add>, %2, %cst_5 [0] : vector<2x256xf32> to vector<256xf32>
    %5 = vector.shape_cast %4 : vector<256xf32> to vector<1x256xf32>
    %cst_6 = arith.constant 2.000000e+00 : f32
    %6 = vector.broadcast %cst_6 : f32 to vector<1x256xf32>
    %7 = arith.divf %5, %6 : vector<1x256xf32>
    %8 = arith.mulf %2, %2 : vector<2x256xf32>
    %cst_7 = arith.constant dense<0.000000e+00> : vector<256xf32>
    %9 = vector.multi_reduction <add>, %8, %cst_7 [0] : vector<2x256xf32> to vector<256xf32>
    %10 = vector.shape_cast %9 : vector<256xf32> to vector<1x256xf32>
    %cst_8 = arith.constant 2.000000e+00 : f32
    %11 = vector.broadcast %cst_8 : f32 to vector<1x256xf32>
    %12 = arith.divf %10, %11 : vector<1x256xf32>
    %13 = arith.mulf %7, %7 : vector<1x256xf32>
    %14 = arith.subf %12, %13 : vector<1x256xf32>
    %cst_9 = arith.constant 0.000000e+00 : f32
    %15 = vector.broadcast %cst_9 : f32 to vector<1x256xf32>
    %16 = arith.maximumf %14, %15 : vector<1x256xf32>
    %17 = vector.extract_strided_slice %3 {offsets = [0, 0], sizes = [1, 256], strides = [1, 1]} : vector<2x256xf32> to vector<1x256xf32>
    %cst_10 = arith.constant 9.99999974E-6 : f32
    %18 = vector.broadcast %cst_10 : f32 to vector<1x256xf32>
    %19 = arith.addf %16, %18 : vector<1x256xf32>
    %20 = math.rsqrt %19 : vector<1x256xf32>
    %21 = arith.mulf %17, %20 : vector<1x256xf32>
    %22 = vector.extract_strided_slice %3 {offsets = [1, 0], sizes = [1, 256], strides = [1, 1]} : vector<2x256xf32> to vector<1x256xf32>
    %23 = arith.mulf %7, %21 : vector<1x256xf32>
    %24 = arith.subf %22, %23 : vector<1x256xf32>
    %25 = vector.broadcast %21 : vector<1x256xf32> to vector<2x256xf32>
    %26 = arith.mulf %2, %25 : vector<2x256xf32>
    %27 = vector.broadcast %24 : vector<1x256xf32> to vector<2x256xf32>
    %28 = arith.addf %26, %27 : vector<2x256xf32>
    %cst_11 = arith.constant 0.000000e+00 : f32
    %29 = vector.broadcast %cst_11 : f32 to vector<2x256xf32>
    %30 = arith.maximumf %28, %29 : vector<2x256xf32>
    %31 = arith.truncf %30 : vector<2x256xf32> to vector<2x256xbf16>
    %c0_12 = arith.constant 0 : index
    %c0_13 = arith.constant 0 : index
    %32 = vector.load %arg4[%c0_12, %c0_13] : memref<256x256xbf16, #tpu.memory_space<vmem>>, vector<256x256xbf16>
    %cst_14 = arith.constant dense<0.000000e+00> : vector<2x256xf32>
    %33 = tpu.matmul %31, %32, %cst_14 {dimension_numbers = #tpu.dot_dimension_numbers<[1], [0], [0], [1], [0, 0, 1, 1], [], []>} : vector<2x256xbf16>, vector<256x256xbf16>, vector<2x256xf32> -> vector<2x256xf32>
    %c0_15 = arith.constant 0 : index
    %c0_16 = arith.constant 0 : index
    %34 = vector.load %arg5[%c0_15, %c0_16] : memref<2x256xf32, #tpu.memory_space<vmem>>, vector<2x256xf32>
    %cst_17 = arith.constant dense<0.000000e+00> : vector<256xf32>
    %35 = vector.multi_reduction <add>, %33, %cst_17 [0] : vector<2x256xf32> to vector<256xf32>
    %36 = vector.shape_cast %35 : vector<256xf32> to vector<1x256xf32>
    %cst_18 = arith.constant 2.000000e+00 : f32
    %37 = vector.broadcast %cst_18 : f32 to vector<1x256xf32>
    %38 = arith.divf %36, %37 : vector<1x256xf32>
    %39 = arith.mulf %33, %33 : vector<2x256xf32>
    %cst_19 = arith.constant dense<0.000000e+00> : vector<256xf32>
    %40 = vector.multi_reduction <add>, %39, %cst_19 [0] : vector<2x256xf32> to vector<256xf32>
    %41 = vector.shape_cast %40 : vector<256xf32> to vector<1x256xf32>
    %cst_20 = arith.constant 2.000000e+00 : f32
    %42 = vector.broadcast %cst_20 : f32 to vector<1x256xf32>
    %43 = arith.divf %41, %42 : vector<1x256xf32>
    %44 = arith.mulf %38, %38 : vector<1x256xf32>
    %45 = arith.subf %43, %44 : vector<1x256xf32>
    %cst_21 = arith.constant 0.000000e+00 : f32
    %46 = vector.broadcast %cst_21 : f32 to vector<1x256xf32>
    %47 = arith.maximumf %45, %46 : vector<1x256xf32>
    %48 = vector.extract_strided_slice %34 {offsets = [0, 0], sizes = [1, 256], strides = [1, 1]} : vector<2x256xf32> to vector<1x256xf32>
    %cst_22 = arith.constant 9.99999974E-6 : f32
    %49 = vector.broadcast %cst_22 : f32 to vector<1x256xf32>
    %50 = arith.addf %47, %49 : vector<1x256xf32>
    %51 = math.rsqrt %50 : vector<1x256xf32>
    %52 = arith.mulf %48, %51 : vector<1x256xf32>
    %53 = vector.extract_strided_slice %34 {offsets = [1, 0], sizes = [1, 256], strides = [1, 1]} : vector<2x256xf32> to vector<1x256xf32>
    %54 = arith.mulf %38, %52 : vector<1x256xf32>
    %55 = arith.subf %53, %54 : vector<1x256xf32>
    %56 = vector.broadcast %52 : vector<1x256xf32> to vector<2x256xf32>
    %57 = arith.mulf %33, %56 : vector<2x256xf32>
    %58 = vector.broadcast %55 : vector<1x256xf32> to vector<2x256xf32>
    %59 = arith.addf %57, %58 : vector<2x256xf32>
    %cst_23 = arith.constant 0.000000e+00 : f32
    %60 = vector.broadcast %cst_23 : f32 to vector<2x256xf32>
    %61 = arith.maximumf %59, %60 : vector<2x256xf32>
    %62 = arith.truncf %61 : vector<2x256xf32> to vector<2x256xbf16>
    %c0_24 = arith.constant 0 : index
    %c0_25 = arith.constant 0 : index
    %63 = vector.load %arg6[%c0_24, %c0_25] : memref<256x128xbf16, #tpu.memory_space<vmem>>, vector<256x128xbf16>
    %cst_26 = arith.constant dense<0.000000e+00> : vector<2x128xf32>
    %64 = tpu.matmul %62, %63, %cst_26 {dimension_numbers = #tpu.dot_dimension_numbers<[1], [0], [0], [1], [0, 0, 1, 1], [], []>} : vector<2x256xbf16>, vector<256x128xbf16>, vector<2x128xf32> -> vector<2x128xf32>
    %c0_27 = arith.constant 0 : index
    %c0_28 = arith.constant 0 : index
    %65 = vector.load %arg7[%c0_27, %c0_28] : memref<1x128xf32, #tpu.memory_space<vmem>>, vector<1x128xf32>
    %66 = vector.broadcast %65 : vector<1x128xf32> to vector<2x128xf32>
    %67 = arith.addf %64, %66 : vector<2x128xf32>
    %c0_29 = arith.constant 0 : index
    %c0_30 = arith.constant 0 : index
    %68 = vector.load %arg8[%c0_29, %c0_30] : memref<2x128xf32, #tpu.memory_space<vmem>>, vector<2x128xf32>
    tpu.vector_store %arg8[%c0_29, %c0_30], %67 {strides = array<i32>} : memref<2x128xf32, #tpu.memory_space<vmem>>, vector<2x128xf32>,
    return
  }
  func.func @transform_0(%arg0: i32) -> (i32, i32) {
    %c0_i32 = arith.constant 0 : i32
    %c0_i32_0 = arith.constant 0 : i32
    %c0_i32_1 = arith.constant 0 : i32
    return %c0_i32, %c0_i32_0 : i32, i32
  }
  func.func @transform_1(%arg0: i32) -> (i32, i32) {
    %c0_i32 = arith.constant 0 : i32
    %c0_i32_0 = arith.constant 0 : i32
    %c0_i32_1 = arith.constant 0 : i32
    return %c0_i32, %c0_i32_0 : i32, i32
  }
  func.func @transform_2(%arg0: i32) -> (i32, i32) {
    %c0_i32 = arith.constant 0 : i32
    %c0_i32_0 = arith.constant 0 : i32
    %c0_i32_1 = arith.constant 0 : i32
    return %c0_i32, %c0_i32_0 : i32, i32
  }
  func.func @transform_3(%arg0: i32) -> (i32, i32) {
    %c0_i32 = arith.constant 0 : i32
    %c0_i32_0 = arith.constant 0 : i32
    %c0_i32_1 = arith.constant 0 : i32
    return %c0_i32, %c0_i32_0 : i32, i32
  }
  func.func @transform_4(%arg0: i32) -> (i32, i32) {
    %c0_i32 = arith.constant 0 : i32
    %c0_i32_0 = arith.constant 0 : i32
    %c0_i32_1 = arith.constant 0 : i32
    return %c0_i32, %c0_i32_0 : i32, i32
  }
  func.func @transform_5(%arg0: i32) -> (i32, i32) {
    %c0_i32 = arith.constant 0 : i32
    %c0_i32_0 = arith.constant 0 : i32
    %c0_i32_1 = arith.constant 0 : i32
    return %c0_i32, %c0_i32_0 : i32, i32
  }
  func.func @transform_6(%arg0: i32) -> (i32, i32) {
    %c0_i32 = arith.constant 0 : i32
    %c0_i32_0 = arith.constant 0 : i32
    %c0_i32_1 = arith.constant 0 : i32
    return %c0_i32, %c0_i32_0 : i32, i32
  }
  func.func @transform_7(%arg0: i32) -> (i32, i32) {
    %c0_i32 = arith.constant 0 : i32
    %c0_i32_0 = arith.constant 0 : i32
    %c0_i32_1 = arith.constant 0 : i32
    return %c0_i32, %c0_i32_0 : i32, i32
  }
}

</mosaic_0001>

<bundles_post_ra>
// kernel: tpu_custom_call.1
= control target key start
LH: loop header
LB: loop body
LE: loop exit
PB: predicated region body
PF: predicated region fallthrough
CT: control target
= control target key end

     0   :  { %12 = vsyncpa [#allocation3], 0  ;;  %s1259_s0 = inlined_call_operand.hbm [shape: bf16[2,4], index: 0, kind: input, shape index: {}]   ;;  %s1260_s1 = inlined_call_operand.hbm [shape: bf16[4,256], index: 1, kind: input, shape index: {}]   ;;  %s1261_s2 = inlined_call_operand.vmem [shape: f32[2,256], index: 2, kind: input, shape index: {}]   ;;  %s1262_s3 = inlined_call_operand.hbm [shape: bf16[256,256], index: 3, kind: input, shape index: {}]   ;;  %s1263_s4 = inlined_call_operand.vmem [shape: f32[2,256], index: 4, kind: input, shape index: {}]   ;;  %s1264_s5 = inlined_call_operand.hbm [shape: bf16[256,128], index: 5, kind: input, shape index: {}]   ;;  %s1265_s6 = inlined_call_operand.vmem [shape: f32[1,128], index: 6, kind: input, shape index: {}]   ;;  %s1266_s7 = inlined_call_operand.hbm [shape: f32[2,128], index: 7, kind: output, shape index: {}]  }
   0x1   :  { %13 = vsyncpa [#allocation6], 0 }
   0x2   :  { %14 = vsyncpa [#allocation9], 0 }
   0x3   :  { %15 = vsyncpa [#allocation4], 0  ;;  %s1080_s24 = smov [#allocation5]   ;;  %s1081_s26 = smov [#allocation2]  }
   0x4   :  { %s32_s25 = sshll.u32 %s1080_s24, 4  ;;  %s22_s27 = sshll.u32 %s1081_s26, 4  ;;  %s33_s25 = int_to_ptr.vmem [resolvable:$true] %s32_s25  ;;  %s23_s27 = int_to_ptr.vmem [resolvable:$true] %s22_s27 }
   0x5   :  { %s962_s30 = scalar_lea.hbm %s1260_s1, 64 }
   0x6   :  { %p963_p0 = scmp.ne.s32.totalorder %s1260_s1, %s962_s30  ;;  %p966_p1 = scmp.lt.u32.totalorder %s962_s30, %s1260_s1 }
   0x8   :  { %p968_p2 = pnand %p966_p1, %p963_p0 }
   0xa   :  { %971 = shalt.err (!%p968_p2)
}
   0xb   :  { %s972_s12 = scalar_lea.vmem %s33_s25, 64  ;;  %p977_p4 = scmp.lt.s32.totalorder %s33_s25, %s33_s25 }
   0xc   :  { %p973_p3 = scmp.ne.s32.totalorder %s33_s25, %s972_s12  ;;  %p978_p5 = scmp.lt.s32.totalorder %s972_s12, %s972_s12 }
   0xe   :  { %p979_p6 = por %p978_p5, %p977_p4 }
  0x10   :  { %p980_p7 = pnand %p979_p6, %p973_p3 }
  0x12   :  { %983 = shalt.err (!%p980_p7)
}
  0x13   :  { %35 = dma.hbm_to_vmem [thread:$0]  %s1260_s1, 64, %s33_s25, [#allocation6]  }
  0x14   :  { %s984_s17 = scalar_lea.hbm %s1259_s0, 16 }
  0x15   :  { %p985_p8 = scmp.ne.s32.totalorder %s1259_s0, %s984_s17  ;;  %p988_p9 = scmp.lt.u32.totalorder %s984_s17, %s1259_s0 }
  0x17   :  { %p990_p10 = pnand %p988_p9, %p985_p8 }
  0x19   :  { %993 = shalt.err (!%p990_p10)
}
  0x1a   :  { %s994_s22 = scalar_lea.vmem %s23_s27, 16  ;;  %s998_s23 = scalar_lea.vmem %s23_s27, 32 }
  0x1b   :  { %p995_p11 = scmp.ne.s32.totalorder %s23_s27, %s994_s22  ;;  %p999_p12 = scmp.lt.s32.totalorder %s23_s27, %s23_s27 }
  0x1c   :  { %p1000_p13 = scmp.lt.s32.totalorder %s998_s23, %s994_s22 }
  0x1e   :  { %p1001_p0 = por %p1000_p13, %p999_p12 }
  0x20   :  { %p1002_p1 = pnand %p1001_p0, %p995_p11 }
  0x22   :  { %1005 = shalt.err (!%p1002_p1)
}
  0x23   :  { %25 = dma.hbm_to_vmem [thread:$0]  %s1259_s0, 16, %s23_s27, [#allocation3]  }
  0x24   :  { %s1082_s25 = smov [#allocation7]   ;;  %s1006_s30 = scalar_lea.hbm %s1262_s3, 4096 }
  0x25   :  { %s43_s26 = sshll.u32 %s1082_s25, 4  ;;  %p1007_p2 = scmp.ne.s32.totalorder %s1262_s3, %s1006_s30  ;;  %s44_s26 = int_to_ptr.vmem [resolvable:$true] %s43_s26 }
  0x26   :  { %p1010_p3 = scmp.lt.u32.totalorder %s1006_s30, %s1262_s3 }
  0x28   :  { %p1012_p4 = pnand %p1010_p3, %p1007_p2 }
  0x2a   :  { %1015 = shalt.err (!%p1012_p4)
}
  0x2b   :  { %s1016_s12 = scalar_lea.vmem %s44_s26, 4096  ;;  %p1021_p6 = scmp.lt.s32.totalorder %s44_s26, %s44_s26 }
  0x2c   :  { %p1017_p5 = scmp.ne.s32.totalorder %s44_s26, %s1016_s12  ;;  %p1022_p7 = scmp.lt.s32.totalorder %s1016_s12, %s1016_s12 }
  0x2e   :  { %p1023_p8 = por %p1022_p7, %p1021_p6 }
  0x30   :  { %p1024_p9 = pnand %p1023_p8, %p1017_p5 }
  0x32   :  { %1027 = shalt.err (!%p1024_p9)
}
  0x33   :  { %s1083_s0 = smov 128   ;;  %s1084_s27 = smov 8  }
  0x34   :  { %49 = dma.hbm_to_vmem [thread:$0]  %s1262_s3, 4096, %s44_s26, [#allocation6], %s1083_s0, %s1083_s0, %s1084_s27  }
  0x35   :  { %s1085_s15 = smov [#allocation8]   ;;  %s1028_s19 = scalar_lea.hbm %s1264_s5, 2048 }
  0x36   :  { %s57_s16 = sshll.u32 %s1085_s15, 4  ;;  %p1029_p10 = scmp.ne.s32.totalorder %s1264_s5, %s1028_s19  ;;  %s58_s16 = int_to_ptr.vmem [resolvable:$true] %s57_s16 }
  0x37   :  { %p1032_p11 = scmp.lt.u32.totalorder %s1028_s19, %s1264_s5 }
  0x39   :  { %p1034_p12 = pnand %p1032_p11, %p1029_p10 }
  0x3b   :  { %1037 = shalt.err (!%p1034_p12)
}
  0x3c   :  { %s1038_s1 = scalar_lea.vmem %s58_s16, 2048  ;;  %p1043_p0 = scmp.lt.s32.totalorder %s58_s16, %s58_s16 }
  0x3d   :  { %p1039_p13 = scmp.ne.s32.totalorder %s58_s16, %s1038_s1  ;;  %p1044_p1 = scmp.lt.s32.totalorder %s1038_s1, %s1038_s1 }
  0x3f   :  { %p1045_p2 = por %p1044_p1, %p1043_p0 }
  0x41   :  { %p1046_p3 = pnand %p1045_p2, %p1039_p13 }
  0x43   :  { %1049 = shalt.err (!%p1046_p3)
}
  0x44   :  { %s1086_s3 = smov 64   ;;  %s1087_s24 = smov 4  }
  0x45   :  { %63 = dma.hbm_to_vmem [thread:$0]  %s1264_s5, 2048, %s58_s16, [#allocation9], %s1086_s3, %s1086_s3, %s1087_s24  }
  0x46   :  { %1072 = dma.done.wait [#allocation3], 16  }
  0x47   :  { %1073 = vsyncadd [#allocation3], 4294967280 }
  0x48   :  { %1074 = dma.done.wait [#allocation6], 4160  }
  0x49   :  { %1075 = vsyncadd [#allocation6], 4294963136 }
  0x4a   :  { %1076 = dma.done.wait [#allocation9], 2048  }
  0x4b   :  { %1077 = vsyncadd [#allocation9], 4294965248  ;;  %v1088_v0 = vmov 0   ;;  %vm94_vm0 = vcmask 1041408   ;;  %v79_v4 = vld [vmem:[#allocation2] sm:$0x1] }
  0x4c   :  { %133 = vmatprep.mubr.bf16.mxu0 %v1088_v0  ;;  %v805_v1 = vld.sshfl [vmem:[#allocation5] sm:$0x33 pattern:$0x76325410]  ;;  %vm90_vm1 = vcmask 31744   ;;  %s1090_s8 = smov [#allocation10]  }
  0x4d   :  { %v89_v2 = vcombine.high %v805_v1, %v805_v1  ;;  %v96_v3 = vsel %vm94_vm0, %v805_v1, 0  ;;  %v890_v5 = vld [vmem:[#allocation7 + $0x4] ss:$8 sps:$4 sm:$0xff]   ;;  %v892_v6 = vld [vmem:[#allocation7] ss:$8 sps:$4 sm:$0xff]   ;;  %s794_s9 = sshll.u32 %s1090_s8, 4  ;;  %s795_s9 = int_to_ptr.vmem [resolvable:$true] %s794_s9 }
  0x4e   :  { %453 = vmatprep.subr.bf16.mxu1 %v890_v5  ;;  %v893_v7 = vld [vmem:[#allocation7 + $0x14] ss:$8 sps:$4 sm:$0xff]   ;;  %v895_v8 = vld [vmem:[#allocation7 + $0x10] ss:$8 sps:$4 sm:$0xff]   ;;  %v896_v9 = vld [vmem:[#allocation7 + $0x24] ss:$8 sps:$4 sm:$0xff]   ;;  %p1055_p5 = scmp.lt.s32.totalorder %s795_s9, %s795_s9 }
  0x4f   :  { %806 = vmatprep.subr.msk.bf16.mxu0 %vm94_vm0, %v89_v2  ;;  %454 = vmatpush1.bf16.msra.mxu1 %v892_v6  ;;  %v898_v10 = vld [vmem:[#allocation7 + $0x20] ss:$8 sps:$4 sm:$0xff]   ;;  %v899_v11 = vld [vmem:[#allocation7 + $0x34] ss:$8 sps:$4 sm:$0xff]   ;;  %v901_v12 = vld [vmem:[#allocation7 + $0x30] ss:$8 sps:$4 sm:$0xff]  }
  0x50   :  { %102 = vmatpush1.bf16.msra.mxu0 %v96_v3  ;;  %455 = vmatprep.subr.bf16.mxu1 %v893_v7  ;;  %v902_v13 = vld [vmem:[#allocation7 + $0x44] ss:$8 sps:$4 sm:$0xff]   ;;  %v904_v14 = vld [vmem:[#allocation7 + $0x40] ss:$8 sps:$4 sm:$0xff]   ;;  %v905_v15 = vld [vmem:[#allocation7 + $0x54] ss:$8 sps:$4 sm:$0xff]  }
  0x51   :  { %v907_v16 = vld [vmem:[#allocation7 + $0x50] ss:$8 sps:$4 sm:$0xff]   ;;  %v908_v17 = vld [vmem:[#allocation7 + $0x64] ss:$8 sps:$4 sm:$0xff]   ;;  %v910_v18 = vld [vmem:[#allocation7 + $0x60] ss:$8 sps:$4 sm:$0xff]  }
  0x52   :  { %v911_v19 = vld [vmem:[#allocation7 + $0x74] ss:$8 sps:$4 sm:$0xff]   ;;  %v913_v20 = vld [vmem:[#allocation7 + $0x70] ss:$8 sps:$4 sm:$0xff]   ;;  %v914_v21 = vld [vmem:[#allocation7 + $0x84] ss:$8 sps:$4 sm:$0xff]  }
  0x53   :  { %807 = vmatmul.mubr.msk.bf16.vlgmr.msra.gmra.mrb[0].mxu0 %vm90_vm1, %v79_v4  ;;  %456 = vmatpush1.bf16.msra.mxu1 %v895_v8  ;;  %v916_v22 = vld [vmem:[#allocation7 + $0x80] ss:$8 sps:$4 sm:$0xff]   ;;  %v917_v23 = vld [vmem:[#allocation7 + $0x94] ss:$8 sps:$4 sm:$0xff]   ;;  %v919_v24 = vld [vmem:[#allocation7 + $0x90] ss:$8 sps:$4 sm:$0xff]  }
  0x54   :  { %457 = vmatprep.subr.bf16.mxu1 %v896_v9  ;;  %v920_v25 = vld [vmem:[#allocation7 + $0xa4] ss:$8 sps:$4 sm:$0xff]   ;;  %v922_v26 = vld [vmem:[#allocation7 + $0xa0] ss:$8 sps:$4 sm:$0xff]   ;;  %v923_v27 = vld [vmem:[#allocation7 + $0xb4] ss:$8 sps:$4 sm:$0xff]  }
  0x55   :  { %v925_v28 = vld [vmem:[#allocation7 + $0xb0] ss:$8 sps:$4 sm:$0xff]   ;;  %v926_v29 = vld [vmem:[#allocation7 + $0xc4] ss:$8 sps:$4 sm:$0xff]   ;;  %v928_v30 = vld [vmem:[#allocation7 + $0xc0] ss:$8 sps:$4 sm:$0xff]  }
  0x56   :  { %v929_v31 = vld [vmem:[#allocation7 + $0xd4] ss:$8 sps:$4 sm:$0xff]   ;;  %v931_v32 = vld [vmem:[#allocation7 + $0xd0] ss:$8 sps:$4 sm:$0xff]   ;;  %v932_v33 = vld [vmem:[#allocation7 + $0xe4] ss:$8 sps:$4 sm:$0xff]  }
  0x57   :  { %458 = vmatpush1.bf16.msra.mxu1 %v898_v10  ;;  %v934_v34 = vld [vmem:[#allocation7 + $0xe0] ss:$8 sps:$4 sm:$0xff]   ;;  %v935_v35 = vld [vmem:[#allocation7 + $0xf4] ss:$8 sps:$4 sm:$0xff]   ;;  %v937_v36 = vld [vmem:[#allocation7 + $0xf0] ss:$8 sps:$4 sm:$0xff]  }
  0x58   :  { %459 = vmatprep.subr.bf16.mxu1 %v899_v11  ;;  %s1050_s10 = scalar_lea.vmem %s795_s9, 32 }
  0x59   :  { %p1051_p4 = scmp.ne.s32.totalorder %s795_s9, %s1050_s10  ;;  %p1056_p6 = scmp.lt.s32.totalorder %s1050_s10, %s1050_s10 }
  0x5b   :  { %460 = vmatpush1.bf16.msra.mxu1 %v901_v12  ;;  %p1057_p7 = por %p1056_p6, %p1055_p5 }
  0x5c   :  { %461 = vmatprep.subr.bf16.mxu1 %v902_v13 }
  0x5d   :  { %p1058_p8 = pnand %p1057_p7, %p1051_p4 }
  0x5f   :  { %462 = vmatpush1.bf16.msra.mxu1 %v904_v14 }
  0x60   :  { %463 = vmatprep.subr.bf16.mxu1 %v905_v15 }
  0x63   :  { %464 = vmatpush1.bf16.msra.mxu1 %v907_v16 }
  0x64   :  { %465 = vmatprep.subr.bf16.mxu1 %v908_v17 }
  0x67   :  { %466 = vmatpush1.bf16.msra.mxu1 %v910_v18 }
  0x68   :  { %467 = vmatprep.subr.bf16.mxu1 %v911_v19  ;;  %v1089_v19 = vmov 1983009808  }
  0x6b   :  { %468 = vmatpush1.bf16.msra.mxu1 %v913_v20  ;;  %v192_v20 = vunpack.c.l.s4 %v1089_v19 }
  0x6c   :  { %469 = vmatprep.subr.bf16.mxu1 %v914_v21  ;;  %v194_v21 = vlaneseq }
  0x6f   :  { %470 = vmatpush1.bf16.msra.mxu1 %v916_v22  ;;  %v193_v22 = vunpack.c.0.s8 %v192_v20 }
  0x70   :  { %471 = vmatprep.subr.bf16.mxu1 %v917_v23  ;;  %v1195_v23 = vshrl.u32 %v194_v21, 7 }
  0x73   :  { %472 = vmatpush1.bf16.msra.mxu1 %v919_v24 }
  0x74   :  { %473 = vmatprep.subr.bf16.mxu1 %v920_v25  ;;  %v1198_v25 = vsub.s32 %v193_v22, %v1195_v23 }
  0x77   :  { %474 = vmatpush1.bf16.msra.mxu1 %v922_v26 }
  0x78   :  { %475 = vmatprep.subr.bf16.mxu1 %v923_v27 }
  0x7b   :  { %476 = vmatpush1.bf16.msra.mxu1 %v925_v28  ;;  %v142_v28 = vld [vmem:[%s1261_s2] sm:$0xf] }
  0x7c   :  { %477 = vmatprep.subr.bf16.mxu1 %v926_v29 }
  0x7f   :  { %478 = vmatpush1.bf16.msra.mxu1 %v928_v30  ;;  %v1205_v30 = vsub.s32 0, %v1195_v23 }
  0x80   :  { %479 = vmatprep.subr.bf16.mxu1 %v929_v31  ;;  %v207_v31 = vsub.s32 2, %v1195_v23 }
  0x83   :  { %480 = vmatpush1.bf16.msra.mxu1 %v931_v32 }
  0x84   :  { %481 = vmatprep.subr.bf16.mxu1 %v932_v33 }
  0x87   :  { %482 = vmatpush1.bf16.msra.mxu1 %v934_v34 }
  0x88   :  { %483 = vmatprep.subr.bf16.mxu1 %v935_v35 }
  0x8b   :  { %484 = vmatpush1.bf16.msra.mxu1 %v937_v36 }
 0x126   :  { %v1181_v37 = vpop.f32.mrb[0].mxu0 }
 0x127   :  { %v143_v38 = vsel %vm94_vm0, %v1181_v37, 0.0  ;;  %v160_v39 = vmul.f32 %v1181_v37, %v1181_v37  ;;  %v1187_v40 = vpop.f32.mrb[1].mxu0 }
 0x128   :  { %v144_v41 = vrot.slane %v143_v38, 4  ;;  %v150_v42 = vsel %vm94_vm0, %v1187_v40, 0.0  ;;  %v161_v43 = vmul.f32 %v1187_v40, %v1187_v40  ;;  %v139_v44 = vpop.f32.mrb[2].mxu0 }
 0x129   :  { %v162_v45 = vsel %vm94_vm0, %v160_v39, 0.0  ;;  %v151_v46 = vrot.slane %v150_v42, 4  ;;  %v140_v47 = vpop.f32.mrb[3].mxu0 }
 0x12a   :  { %v145_v48 = vadd.f32 %v144_v41, %v143_v38  ;;  %v163_v49 = vrot.slane %v162_v45, 4  ;;  %v169_v50 = vsel %vm94_vm0, %v161_v43, 0.0  ;;  %v243_v47 = vsub.s32 3, %v1195_v23 }
 0x12b   :  { %v152_v51 = vadd.f32 %v151_v46, %v150_v42  ;;  %v170_v52 = vrot.slane %v169_v50, 4  ;;  %v1217_v46 = vsub.s32 1, %v1195_v23  ;;  %v840_v23 = vld [vmem:[%s1265_s6] ss:$0 sm:$0xff] }
 0x12c   :  { %v146_v53 = vrot.slane %v145_v48, 2  ;;  %v164_v54 = vadd.f32 %v163_v49, %v162_v45 }
 0x12d   :  { %v153_v55 = vrot.slane %v152_v51, 2  ;;  %v171_v56 = vadd.f32 %v170_v52, %v169_v50 }
 0x12e   :  { %v147_v57 = vadd.f32 %v146_v53, %v145_v48  ;;  %v165_v58 = vrot.slane %v164_v54, 2 }
 0x12f   :  { %v154_v59 = vadd.f32 %v153_v55, %v152_v51  ;;  %v172_v60 = vrot.slane %v171_v56, 2 }
 0x130   :  { %v148_v61 = vrot.slane %v147_v57, 1  ;;  %v166_v62 = vadd.f32 %v165_v58, %v164_v54  ;;  %v939_v58 = vld [vmem:[#allocation8] sm:$0xff]  }
 0x131   :  { %v155_v63 = vrot.slane %v154_v59, 1  ;;  %v173_v0 = vadd.f32 %v172_v60, %v171_v56  ;;  %v941_v60 = vld [vmem:[#allocation8 + $0x8] sm:$0xff]  }
 0x132   :  { %v149_v1 = vadd.f32 %v148_v61, %v147_v57  ;;  %v167_v2 = vrot.slane %v166_v62, 1  ;;  %v938_v57 = vld [vmem:[#allocation8 + $0x40] sm:$0xff]   ;;  %v942_v61 = vld [vmem:[#allocation8 + $0x50] sm:$0xff]  }
 0x133   :  { %v156_v3 = vadd.f32 %v155_v63, %v154_v59  ;;  %v174_v4 = vrot.slane %v173_v0, 1  ;;  %857 = vmatprep.subr.bf16.mxu0 %v938_v57  ;;  %v940_v59 = vld [vmem:[#allocation8 + $0x48] sm:$0xff]   ;;  %v944_v63 = vld [vmem:[#allocation8 + $0x58] sm:$0xff]  }
 0x134   :  { %v158_v5 = vmul.f32 0.5, %v149_v1  ;;  %v168_v6 = vadd.f32 %v167_v2, %v166_v62  ;;  %858 = vmatpush3.bf16.msra.mxu0 %v939_v58  ;;  %v943_v62 = vld [vmem:[#allocation8 + $0x10] sm:$0xff]   ;;  %v946_v1 = vld [vmem:[#allocation8 + $0x60] sm:$0xff]  }
 0x135   :  { %v159_v7 = vmul.f32 0.5, %v156_v3  ;;  %v175_v8 = vadd.f32 %v174_v4, %v173_v0  ;;  %859 = vmatprep.subr.bf16.mxu0 %v940_v59  ;;  %v945_v0 = vld [vmem:[#allocation8 + $0x18] sm:$0xff]   ;;  %v947_v2 = vld [vmem:[#allocation8 + $0x20] sm:$0xff]   ;;  %v948_v3 = vld [vmem:[#allocation8 + $0x68] sm:$0xff]  }
 0x136   :  { %v176_v9 = vmul.f32 0.5, %v168_v6  ;;  %v178_v10 = vmul.f32 %v158_v5, %v158_v5  ;;  %v949_v4 = vld [vmem:[#allocation8 + $0x28] sm:$0xff]   ;;  %v951_v6 = vld [vmem:[#allocation8 + $0x30] sm:$0xff]  }
 0x137   :  { %v177_v11 = vmul.f32 0.5, %v175_v8  ;;  %v179_v12 = vmul.f32 %v159_v7, %v159_v7  ;;  %v953_v8 = vld [vmem:[#allocation8 + $0x38] sm:$0xff]  }
 0x138   :  { %v180_v13 = vsub.f32 %v176_v9, %v178_v10  ;;  %860 = vmatpush3.bf16.msra.mxu0 %v941_v60 }
 0x139   :  { %v181_v14 = vsub.f32 %v177_v11, %v179_v12  ;;  %861 = vmatprep.subr.bf16.mxu0 %v942_v61 }
 0x13a   :  { %v182_v15 = vmax.f32 %v180_v13, 0.0 }
 0x13b   :  { %v183_v16 = vmax.f32 %v181_v14, 0.0 }
 0x13c   :  { %v184_v17 = vadd.f32 1e-05, %v182_v15  ;;  %862 = vmatpush3.bf16.msra.mxu0 %v943_v62 }
 0x13d   :  { %v185_v18 = vadd.f32 1e-05, %v183_v16  ;;  %863 = vmatprep.subr.bf16.mxu0 %v944_v63 }
 0x13e   :  { %954 = vrsqrt.f32 %v184_v17 }
 0x13f   :  { %956 = vrsqrt.f32 %v185_v18 }
 0x140   :  { %864 = vmatpush3.bf16.msra.mxu0 %v945_v0  ;;  %v494_v0 = vld [vmem:[%s1263_s4] sm:$0xf] }
 0x141   :  { %865 = vmatprep.subr.bf16.mxu0 %v946_v1 }
 0x144   :  { %866 = vmatpush3.bf16.msra.mxu0 %v947_v2 }
 0x145   :  { %867 = vmatprep.subr.bf16.mxu0 %v948_v3 }
 0x148   :  { %v955_v24 = vpop.eup %954  ;;  %868 = vmatpush3.bf16.msra.mxu0 %v949_v4 }
 0x149   :  { %v957_v26 = vpop.eup %956 }
 0x14a   :  { %v190_v27 = vcombine.low %v955_v24, %v957_v26 }
 0x14c   :  { %v197_v29 = vrot.slane %v190_v27, %v1198_v25 }
 0x14e   :  { %v199_v32 = vmul.f32 %v197_v29, %v142_v28 }
 0x150   :  { %v204_v33 = vrot.slane %v199_v32, %v1205_v30  ;;  %v208_v34 = vrot.slane %v199_v32, %v207_v31 }
 0x152   :  { %v211_v35 = vmul.f32 %v204_v33, %v158_v5  ;;  %v212_v36 = vmul.f32 %v208_v34, %v159_v7  ;;  %v233_v38 = vrot.slane %v208_v34, %v1205_v30  ;;  %v229_v39 = vrot.slane %v204_v33, %v1205_v30  ;;  %v950_v5 = vld [vmem:[#allocation8 + $0x70] sm:$0xff]   ;;  %v952_v7 = vld [vmem:[#allocation8 + $0x78] sm:$0xff]  }
 0x153   :  { %869 = vmatprep.subr.bf16.mxu0 %v950_v5 }
 0x154   :  { %v215_v41 = vcombine.low %v211_v35, %v212_v36  ;;  %v235_v42 = vmul.f32 %v233_v38, %v1187_v40  ;;  %v234_v43 = vmul.f32 %v229_v39, %v1181_v37  ;;  %870 = vmatpush3.bf16.msra.mxu0 %v951_v6 }
 0x155   :  { %871 = vmatprep.subr.bf16.mxu0 %v952_v7 }
 0x156   :  { %v222_v44 = vrot.slane %v215_v41, %v1198_v25 }
 0x158   :  { %v223_v45 = vrot.slane %v222_v44, 7  ;;  %872 = vmatpush3.bf16.msra.mxu0 %v953_v8 }
 0x15a   :  { %v225_v48 = vsub.f32 %v142_v28, %v223_v45 }
 0x15c   :  { %v244_v49 = vrot.slane %v225_v48, %v243_v47  ;;  %v240_v50 = vrot.slane %v225_v48, %v1217_v46 }
 0x15e   :  { %v254_v51 = vrot.slane %v244_v49, %v1217_v46  ;;  %v250_v40 = vrot.slane %v240_v50, %v1217_v46 }
 0x160   :  { %v256_v52 = vadd.f32 %v254_v51, %v235_v42  ;;  %v255_v37 = vadd.f32 %v250_v40, %v234_v43 }
 0x162   :  { %v258_v53 = vmax.f32 %v256_v52, 0.0  ;;  %v257_v54 = vmax.f32 %v255_v37, 0.0 }
 0x164   :  { %v260_v55 = vpack.c.bf16 %v258_v53, %v258_v53  ;;  %v259_v56 = vpack.c.bf16 %v257_v54, %v257_v54 }
 0x166   :  { %485 = vmatprep.mubr.bf16.mxu1 %v260_v55 }
 0x167   :  { %486 = vmatmul.mubr.bf16.vlgmr.msra.gmra.mrb[0].mxu1 %v259_v56 }
 0x23a   :  { %v487_v9 = vpop.f32.mrb[0].mxu1 }
 0x23b   :  { %v495_v10 = vsel %vm94_vm0, %v487_v9, 0.0  ;;  %v511_v11 = vmul.f32 %v487_v9, %v487_v9  ;;  %v489_v12 = vpop.f32.mrb[1].mxu1 }
 0x23c   :  { %v496_v13 = vrot.slane %v495_v10, 4  ;;  %v502_v14 = vsel %vm94_vm0, %v489_v12, 0.0  ;;  %v512_v15 = vmul.f32 %v489_v12, %v489_v12  ;;  %v491_v16 = vpop.f32.mrb[2].mxu1 }
 0x23d   :  { %v513_v17 = vsel %vm94_vm0, %v511_v11, 0.0  ;;  %v503_v18 = vrot.slane %v502_v14, 4  ;;  %v492_v19 = vpop.f32.mrb[3].mxu1 }
 0x23e   :  { %v497_v20 = vadd.f32 %v496_v13, %v495_v10  ;;  %v514_v21 = vrot.slane %v513_v17, 4  ;;  %v520_v22 = vsel %vm94_vm0, %v512_v15, 0.0 }
 0x23f   :  { %v504_v24 = vadd.f32 %v503_v18, %v502_v14  ;;  %v521_v26 = vrot.slane %v520_v22, 4 }
 0x240   :  { %v498_v27 = vrot.slane %v497_v20, 2  ;;  %v515_v28 = vadd.f32 %v514_v21, %v513_v17 }
 0x241   :  { %v505_v29 = vrot.slane %v504_v24, 2  ;;  %v522_v32 = vadd.f32 %v521_v26, %v520_v22 }
 0x242   :  { %v499_v33 = vadd.f32 %v498_v27, %v497_v20  ;;  %v516_v34 = vrot.slane %v515_v28, 2 }
 0x243   :  { %v506_v35 = vadd.f32 %v505_v29, %v504_v24  ;;  %v523_v36 = vrot.slane %v522_v32, 2 }
 0x244   :  { %v500_v38 = vrot.slane %v499_v33, 1  ;;  %v517_v39 = vadd.f32 %v516_v34, %v515_v28 }
 0x245   :  { %v507_v41 = vrot.slane %v506_v35, 1  ;;  %v524_v42 = vadd.f32 %v523_v36, %v522_v32 }
 0x246   :  { %v501_v43 = vadd.f32 %v500_v38, %v499_v33  ;;  %v518_v44 = vrot.slane %v517_v39, 1 }
 0x247   :  { %v508_v45 = vadd.f32 %v507_v41, %v506_v35  ;;  %v525_v48 = vrot.slane %v524_v42, 1 }
 0x248   :  { %v509_v49 = vmul.f32 0.5, %v501_v43  ;;  %v519_v50 = vadd.f32 %v518_v44, %v517_v39 }
 0x249   :  { %v510_v51 = vmul.f32 0.5, %v508_v45  ;;  %v526_v40 = vadd.f32 %v525_v48, %v524_v42 }
 0x24a   :  { %v527_v52 = vmul.f32 0.5, %v519_v50  ;;  %v529_v37 = vmul.f32 %v509_v49, %v509_v49 }
 0x24b   :  { %v528_v53 = vmul.f32 0.5, %v526_v40  ;;  %v530_v54 = vmul.f32 %v510_v51, %v510_v51 }
 0x24c   :  { %v531_v55 = vsub.f32 %v527_v52, %v529_v37 }
 0x24d   :  { %v532_v56 = vsub.f32 %v528_v53, %v530_v54 }
 0x24e   :  { %v533_v57 = vmax.f32 %v531_v55, 0.0 }
 0x24f   :  { %v534_v58 = vmax.f32 %v532_v56, 0.0 }
 0x250   :  { %v535_v59 = vadd.f32 1e-05, %v533_v57 }
 0x251   :  { %v536_v60 = vadd.f32 1e-05, %v534_v58 }
 0x252   :  { %958 = vrsqrt.f32 %v535_v59 }
 0x253   :  { %960 = vrsqrt.f32 %v536_v60 }
 0x25c   :  { %v959_v61 = vpop.eup %958 }
 0x25d   :  { %v961_v62 = vpop.eup %960 }
 0x25e   :  { %v541_v63 = vcombine.low %v959_v61, %v961_v62 }
 0x260   :  { %v548_v1 = vrot.slane %v541_v63, %v1198_v25 }
 0x262   :  { %v550_v2 = vmul.f32 %v548_v1, %v494_v0 }
 0x264   :  { %v555_v3 = vrot.slane %v550_v2, %v1205_v30  ;;  %v559_v4 = vrot.slane %v550_v2, %v207_v31 }
 0x266   :  { %v562_v5 = vmul.f32 %v555_v3, %v509_v49  ;;  %v563_v6 = vmul.f32 %v559_v4, %v510_v51  ;;  %v584_v7 = vrot.slane %v559_v4, %v1205_v30  ;;  %v580_v8 = vrot.slane %v555_v3, %v1205_v30 }
 0x268   :  { %v566_v10 = vcombine.low %v562_v5, %v563_v6  ;;  %v586_v11 = vmul.f32 %v584_v7, %v489_v12  ;;  %v585_v13 = vmul.f32 %v580_v8, %v487_v9 }
 0x26a   :  { %v573_v14 = vrot.slane %v566_v10, %v1198_v25 }
 0x26c   :  { %v574_v15 = vrot.slane %v573_v14, 7 }
 0x26e   :  { %v576_v16 = vsub.f32 %v494_v0, %v574_v15 }
 0x270   :  { %v595_v17 = vrot.slane %v576_v16, %v243_v47  ;;  %v591_v18 = vrot.slane %v576_v16, %v1217_v46 }
 0x272   :  { %v605_v31 = vrot.slane %v595_v17, %v1217_v46  ;;  %v601_v19 = vrot.slane %v591_v18, %v1217_v46 }
 0x274   :  { %v607_v20 = vadd.f32 %v605_v31, %v586_v11  ;;  %v606_v21 = vadd.f32 %v601_v19, %v585_v13 }
 0x276   :  { %v609_v22 = vmax.f32 %v607_v20, 0.0  ;;  %v608_v30 = vmax.f32 %v606_v21, 0.0 }
 0x278   :  { %v611_v24 = vpack.c.bf16 %v609_v22, %v609_v22  ;;  %v610_v12 = vpack.c.bf16 %v608_v30, %v608_v30 }
 0x27a   :  { %779 = vmatprep.mubr.bf16.mxu0 %v611_v24 }
 0x27b   :  { %780 = vmatmul.mubr.bf16.vlgmr.msra.gmra.mrb[4].mxu0 %v610_v12 }
 0x34e   :  { %v873_v25 = vpop.f32.mrb[4].mxu0 }
 0x34f   :  { %v874_v47 = vpop.f32.mrb[5].mxu0 }
 0x350   :  { %v875_v9 = vadd.f32 %v874_v47, %v873_v25  ;;  %v876_v26 = vpop.f32.mrb[6].mxu0 }
 0x351   :  { %v877_v27 = vpop.f32.mrb[7].mxu0 }
 0x352   :  { %v782_v46 = vadd.f32 %v875_v9, %v840_v23 }
 0x354   :  { %787 = vst [vmem:[#allocation10] sm:$0x3] %v782_v46 }
 0x355   :  { %1061 = shalt.err (!%p1058_p8)
}
 0x356   :  { %s1062_s6 = scalar_lea.hbm %s1266_s7, 32 }
 0x357   :  { %p1063_p9 = scmp.ne.s32.totalorder %s1266_s7, %s1062_s6  ;;  %p1066_p10 = scmp.lt.u32.totalorder %s1062_s6, %s1266_s7 }
 0x359   :  { %p1068_p11 = pnand %p1066_p10, %p1063_p9 }
 0x35b   :  { %1071 = shalt.err (!%p1068_p11)
}
 0x35c   :  { %797 = dma.vmem_to_hbm [thread:$0]  %s795_s9, 32, %s1266_s7, [#allocation4]  }
 0x35d   :  { %1078 = dma.done.wait [#allocation4], 32  }
 0x35e   :  { %1079 = vsyncadd [#allocation4], 4294967264 }
 0x35f   :  { %801 = vsyncpa [#allocation3], 1 }
 0x360   :  { %802 = vsyncpa [#allocation6], 1 }
 0x361   :  { %803 = vsyncpa [#allocation9], 1 }
 0x362   :  { %804 = vsyncpa [#allocation4], 1 }

</bundles_post_ra>
